<compile_context>
chip_gen: v7x
topology: tpu7x:2x2x1
jax: 0.10.0
libtpu: 0.0.40
codegen_flags: <defaults>
</compile_context>

<pallas_src>
import jax
import jax.numpy as jnp
from jax import lax
from jax.experimental import pallas as pl
from jax.experimental.pallas import tpu as pltpu


def _fc_relu_kernel(x_ref, w_ref, b_ref, o_ref):
    """Grid = (E//tn, K//tk), K innermost.  Accumulates the matmul directly in
    the resident f32 output block; applies bias + ReLU on the last K-tile."""
    k = pl.program_id(1)

    @pl.when(k == 0)
    def _():
        o_ref[...] = jnp.zeros_like(o_ref)

    x = x_ref[...]                                  # (B, tk)   f32
    w = w_ref[...].astype(jnp.float32)              # (tn, tk)  f32 or bf16->f32
    # (B, tk) . (tn, tk), contracting the shared K axis -> (B, tn)
    o_ref[...] += lax.dot_general(
        x, w, (((1,), (1,)), ((), ())), preferred_element_type=jnp.float32
    )

    @pl.when(k == pl.num_programs(1) - 1)
    def _():
        y = o_ref[...] + b_ref[...]                 # bias (1, tn) broadcasts
        o_ref[...] = jnp.maximum(y, 0.0)            # ReLU(inplace=True)


def _l2norm_kernel(y_ref, o_ref):
    """Row-wise L2 normalization: x / torch.norm(x, dim=1, keepdim=True)."""
    y = y_ref[...]
    ssq = jnp.sum(y * y, axis=1, keepdims=True)
    o_ref[...] = (y * lax.rsqrt(ssq)).astype(o_ref.dtype)


def _pick_tile(dim, preferred=(512, 256, 128)):
    for t in preferred:
        if dim % t == 0:
            return t
    return dim  # full-extent block is always legal


def pin_face_forward(face, weight, bias):
    """face: (B, K) f32; weight: (E, K) (PyTorch Linear layout, f32 or bf16);
    bias: (E,) f32.  Returns (B, E) in face.dtype."""
    B, K = face.shape
    E = weight.shape[0]
    assert weight.shape == (E, K)
    assert bias.shape == (E,)

    tk = _pick_tile(K)
    tn = _pick_tile(E)

    b2 = bias.reshape(1, E).astype(jnp.float32)

    # Fused Linear + ReLU, tiled over (E, K); output block doubles as the
    # f32 accumulator (resident across the inner K axis).
    y = pl.pallas_call(
        _fc_relu_kernel,
        out_shape=jax.ShapeDtypeStruct((B, E), jnp.float32),
        grid_spec=pltpu.PrefetchScalarGridSpec(
            num_scalar_prefetch=0,
            grid=(E // tn, K // tk),                           # K (reduction) last
            in_specs=[
                pl.BlockSpec((B, tk), lambda e, k: (0, k)),    # activations
                pl.BlockSpec((tn, tk), lambda e, k: (e, k)),   # weight, (E,K) layout
                pl.BlockSpec((1, tn), lambda e, k: (0, e)),    # bias tile
            ],
            out_specs=pl.BlockSpec((B, tn), lambda e, k: (0, e)),  # resident acc
        ),
        compiler_params=pltpu.CompilerParams(
            dimension_semantics=("parallel", "arbitrary"),
        ),
    )(face, weight, b2)

    # L2 norm needs the full E extent -> tiny second pass over (B, E)
    # (~2*B*E*4 bytes, negligible vs the K*E weight stream).
    out = pl.pallas_call(
        _l2norm_kernel,
        out_shape=jax.ShapeDtypeStruct((B, E), face.dtype),
        grid_spec=pltpu.PrefetchScalarGridSpec(
            num_scalar_prefetch=0,
            grid=(1,),
            in_specs=[pl.BlockSpec((B, E), lambda i: (0, 0))],
            out_specs=pl.BlockSpec((B, E), lambda i: (0, 0)),
        ),
    )(y)
    return out


def reference_forward(face, weight, bias):
    y = face @ weight.T + bias
    y = jnp.maximum(y, 0.0)
    norm = jnp.sqrt(jnp.sum(y * y, axis=1, keepdims=True))
    return y / norm


if __name__ == "__main__":
    # Small but module-consistent shapes: in_features must be 2048 (face_fc).
    B = 8                # batch (multiple of 8 keeps f32 sublane layout clean)
    K = 2048             # face feature dim (fixed by nn.Linear(2048, ...))
    E = 256              # embedding_dim (small stand-in for default 4096)

    key = jax.random.PRNGKey(0)
    k_x, k_w, k_b = jax.random.split(key, 3)

    face = jax.random.normal(k_x, (B, K), dtype=jnp.float32)
    # Deterministic synthetic Linear params (PyTorch layout: weight (E, K)).
    bound = 1.0 / (K ** 0.5)
    weight = jax.random.uniform(k_w, (E, K), minval=-bound, maxval=bound,
                                dtype=jnp.float32)
    bias = jax.random.uniform(k_b, (E,), minval=-bound, maxval=bound,
                              dtype=jnp.float32)

    ref = reference_forward(face, weight, bias)

    # f32-weight path: exact parity with the PyTorch module.
    out = jax.block_until_ready(pin_face_forward(face, weight, bias))
    assert out.shape == (B, E)
    assert jnp.allclose(out, ref, atol=1e-5, rtol=1e-5), "f32 mismatch vs reference"

    # bf16 weight streaming path (one-time parameter cast done OUTSIDE the
    # forward; halves HBM weight bytes, f32 accumulation inside the kernel).
    weight_bf16 = jax.block_until_ready(weight.astype(jnp.bfloat16))
    out_bf16 = jax.block_until_ready(pin_face_forward(face, weight_bf16, bias))
    assert jnp.allclose(out_bf16, ref, atol=1e-2, rtol=1e-1), "bf16 mismatch vs reference"

    print("KERNEL_OK")
</pallas_src>

<mosaic_0001>
module attributes {stable_mosaic.version = 11 : i64} {
  func.func @_fc_relu_kernel(%arg0: i32, %arg1: i32, %arg2: memref<8x512xf32, #tpu.memory_space<vmem>>, %arg3: memref<256x512xf32, #tpu.memory_space<vmem>>, %arg4: memref<1x256xf32, #tpu.memory_space<vmem>>, %arg5: memref<8x256xf32, #tpu.memory_space<vmem>>) attributes {dimension_semantics = [#tpu.dimension_semantics<parallel>, #tpu.dimension_semantics<arbitrary>], iteration_bounds = array<i64: 1, 4>, scalar_prefetch = 0 : i64, scratch_operands = 0 : i64, tpu.core_type = #tpu.core_type<tc>, window_params = [{transform_indices = @transform_0, window_bounds = array<i64: 8, 512>}, {transform_indices = @transform_1, window_bounds = array<i64: 256, 512>}, {transform_indices = @transform_2, window_bounds = array<i64: 1, 256>}, {transform_indices = @transform_3, window_bounds = array<i64: 8, 256>}]} {
    %c0_i32 = arith.constant 0 : i32
    %0 = arith.cmpi eq, %arg1, %c0_i32 : i32
    %1 = arith.extui %0 : i1 to i32
    %c0_i32_0 = arith.constant 0 : i32
    %2 = arith.cmpi ne, %1, %c0_i32_0 : i32
    scf.if %2 {
      %cst_9 = arith.constant 0.000000e+00 : f32
      %12 = vector.broadcast %cst_9 : f32 to vector<8x256xf32>
      %c0_10 = arith.constant 0 : index
      %c0_11 = arith.constant 0 : index
      %13 = vector.load %arg5[%c0_10, %c0_11] : memref<8x256xf32, #tpu.memory_space<vmem>>, vector<8x256xf32>
      tpu.vector_store %arg5[%c0_10, %c0_11], %12 {strides = array<i32>} : memref<8x256xf32, #tpu.memory_space<vmem>>, vector<8x256xf32>,
    } else {
    }
    %c0 = arith.constant 0 : index
    %c0_1 = arith.constant 0 : index
    %3 = vector.load %arg2[%c0, %c0_1] : memref<8x512xf32, #tpu.memory_space<vmem>>, vector<8x512xf32>
    %c0_2 = arith.constant 0 : index
    %c0_3 = arith.constant 0 : index
    %4 = vector.load %arg3[%c0_2, %c0_3] : memref<256x512xf32, #tpu.memory_space<vmem>>, vector<256x512xf32>
    %c0_4 = arith.constant 0 : index
    %c0_5 = arith.constant 0 : index
    %5 = vector.load %arg5[%c0_4, %c0_5] : memref<8x256xf32, #tpu.memory_space<vmem>>, vector<8x256xf32>
    %cst = arith.constant dense<0.000000e+00> : vector<8x256xf32>
    %6 = tpu.matmul %3, %4, %cst {dimension_numbers = #tpu.dot_dimension_numbers<[1], [1], [0], [0], [0, 0, 1, 0], [], []>} : vector<8x512xf32>, vector<256x512xf32>, vector<8x256xf32> -> vector<8x256xf32>
    %7 = arith.addf %5, %6 : vector<8x256xf32>
    %c0_6 = arith.constant 0 : index
    %c0_7 = arith.constant 0 : index
    %8 = vector.load %arg5[%c0_6, %c0_7] : memref<8x256xf32, #tpu.memory_space<vmem>>, vector<8x256xf32>
    tpu.vector_store %arg5[%c0_6, %c0_7], %7 {strides = array<i32>} : memref<8x256xf32, #tpu.memory_space<vmem>>, vector<8x256xf32>,
    %c3_i32 = arith.constant 3 : i32
    %9 = arith.cmpi eq, %arg1, %c3_i32 : i32
    %10 = arith.extui %9 : i1 to i32
    %c0_i32_8 = arith.constant 0 : i32
    %11 = arith.cmpi ne, %10, %c0_i32_8 : i32
    scf.if %11 {
      %c0_9 = arith.constant 0 : index
      %c0_10 = arith.constant 0 : index
      %12 = vector.load %arg5[%c0_9, %c0_10] : memref<8x256xf32, #tpu.memory_space<vmem>>, vector<8x256xf32>
      %c0_11 = arith.constant 0 : index
      %c0_12 = arith.constant 0 : index
      %13 = vector.load %arg4[%c0_11, %c0_12] : memref<1x256xf32, #tpu.memory_space<vmem>>, vector<1x256xf32>
      %14 = vector.broadcast %13 : vector<1x256xf32> to vector<8x256xf32>
      %15 = arith.addf %12, %14 : vector<8x256xf32>
      %cst_13 = arith.constant 0.000000e+00 : f32
      %16 = vector.broadcast %cst_13 : f32 to vector<8x256xf32>
      %17 = arith.maximumf %15, %16 : vector<8x256xf32>
      %c0_14 = arith.constant 0 : index
      %c0_15 = arith.constant 0 : index
      %18 = vector.load %arg5[%c0_14, %c0_15] : memref<8x256xf32, #tpu.memory_space<vmem>>, vector<8x256xf32>
      tpu.vector_store %arg5[%c0_14, %c0_15], %17 {strides = array<i32>} : memref<8x256xf32, #tpu.memory_space<vmem>>, vector<8x256xf32>,
    } else {
    }
    return
  }
  func.func @transform_0(%arg0: i32, %arg1: i32) -> (i32, i32) {
    %c0_i32 = arith.constant 0 : i32
    %c0_i32_0 = arith.constant 0 : i32
    return %c0_i32, %arg1 : i32, i32
  }
  func.func @transform_1(%arg0: i32, %arg1: i32) -> (i32, i32) {
    %c0_i32 = arith.constant 0 : i32
    return %arg0, %arg1 : i32, i32
  }
  func.func @transform_2(%arg0: i32, %arg1: i32) -> (i32, i32) {
    %c0_i32 = arith.constant 0 : i32
    %c0_i32_0 = arith.constant 0 : i32
    return %c0_i32, %arg0 : i32, i32
  }
  func.func @transform_3(%arg0: i32, %arg1: i32) -> (i32, i32) {
    %c0_i32 = arith.constant 0 : i32
    %c0_i32_0 = arith.constant 0 : i32
    return %c0_i32, %arg0 : i32, i32
  }
}

</mosaic_0001>

<bundles_post_ra>
// kernel: tpu_custom_call.1
= control target key start
LH: loop header
LB: loop body
LE: loop exit
PB: predicated region body
PF: predicated region fallthrough
CT: control target
= control target key end

     0   :  { %8 = vsyncpa [#allocation3], 0  ;;  %s1493_s0 = inlined_call_operand.hbm [shape: f32[8,2048], index: 0, kind: input, shape index: {}]   ;;  %s1494_s1 = inlined_call_operand.hbm [shape: f32[256,2048], index: 1, kind: input, shape index: {}]   ;;  %s1495_s2 = inlined_call_operand.hbm [shape: f32[1,256], index: 2, kind: input, shape index: {}]   ;;  %s1496_s3 = inlined_call_operand.hbm [shape: f32[8,256], index: 3, kind: output, shape index: {}]  }
   0x1   :  { %10 = vsyncpa [#allocation3 + $0x1], 0 }
   0x2   :  { %11 = vsyncpa [#allocation6], 0 }
   0x3   :  { %13 = vsyncpa [#allocation6 + $0x1], 0 }
   0x4   :  { %14 = vsyncpa [#allocation4], 0  ;;  %s1120_s12 = smov 0   ;;  %s1122_s13 = smov 0  }
   0x5   :  { %s1124_s14 = smov 0   ;;  %s1126_s15 = smov 0  }
   0x6   :  { %s1128_s16 = smov 0   ;;  %s1130_s17 = smov 0  }
   0x7 LB: > { %s1149_s18 = sadd.s32 4294967295, %s1090_s17   ;;  %p52_p1 = scmp.ne.s32.totalorder %s1074_s13, %s1070_s12  ;;  %s1090_s17 = sphi %s1130_s17, %s20_s17   ;;  %s1086_s16 = sphi %s1128_s16, %s1516_s16   ;;  %s1082_s15 = sphi %s1126_s15, %s1515_s15   ;;  %s1078_s14 = sphi %s1124_s14, %s1514_s14   ;;  %s1074_s13 = sphi %s1122_s13, %s1513_s13   ;;  %s1070_s12 = sphi %s1120_s12, %s1512_s12  }
   0x8   : > { %p1497_p2 = scmp.eq.s32.totalorder %s1149_s18, 0  ;;  %p681_p3 = scmp.ge.s32.totalorder %s1090_s17, 1 }
   0x9   : > { %p143_p4 = scmp.lt.s32.totalorder %s1090_s17, 5  ;;  %s1092_s21 = smov [#allocation7]  }
   0xa   : > { %p1159_p5 = por %p1497_p2, %p52_p1  ;;  %s159_s22 = sshll.u32 %s1092_s21, 4  ;;  %s160_s22 = int_to_ptr.vmem [resolvable:$true] %s159_s22 }
   0xb   : > { %p1163_p6 = pnand %p681_p3, %p143_p4  ;;  %s39_s23 = sadd.s32 1, %s1078_s14 }
   0xc   : > { %s1500_s19 = scalar_select %p1159_p5, 1, 0 }
   0xd   : > { %s1501_s20 = scalar_select %p1163_p6, 1, 0 }
   0xe   : > { %p844_p7 = pneg %p1163_p6  ;;  %s29_s25 = sadd.s32 1, %s1086_s16 }
   0xf   : > { %p1178_p10 = scmp.ge.s32.totalorder %s29_s25, 4  ;;  %s914_s29 = scalar_lea.hbm %s1495_s2, 32 }
  0x10   : > { %p1172_p8 = pnand %p844_p7, %p1497_p2  ;;  %p915_p11 = scmp.ne.s32.totalorder %s1495_s2, %s914_s29 }
  0x11   : > { %s1503_s26 = scalar_select %p1178_p10, 1, 0 }
  0x12   : > { %p916_p12 = pneg %p1172_p8  ;;  %p921_p3 = scmp.lt.u32.totalorder %s914_s29, %s1495_s2 }
  0x14   : > { %p917_p13 = pnand %p916_p12, %p915_p11 }
  0x16   : > { %p918_p1 = pneg %p917_p13 }
  0x18   : > { %p923_p4 = pnand %p921_p3, %p918_p1 }
  0x1a   : > { %926 = shalt.err (!%p923_p4)
}
  0x1b   : > { %s927_s7 = scalar_lea.vmem %s160_s22, 32  ;;  %p935_p0 = scmp.lt.s32.totalorder %s160_s22, %s160_s22 }
  0x1c   : > { %p928_p7 = scmp.ne.s32.totalorder %s160_s22, %s927_s7  ;;  %p936_p5 = scmp.lt.s32.totalorder %s927_s7, %s927_s7 }
  0x1e   : > { %p930_p2 = pnand %p928_p7, %p916_p12  ;;  %p937_p6 = por %p936_p5, %p935_p0 }
  0x20   : > { %p931_p9 = pneg %p930_p2 }
  0x22   : > { %p938_p10 = pnand %p937_p6, %p931_p9 }
  0x24   : > { %941 = shalt.err (!%p938_p10)
}
  0x25   : > { %847 = dma.hbm_to_vmem [thread:$0]  (!%p1172_p8), %s1495_s2, 32, %s160_s22, [#allocation6]  }
  0x26   : > { %p1504_p0 = scmp.ne.s32.totalorder %s1503_s26, 0  ;;  %p1505_p2 = scmp.ne.s32.totalorder %s1078_s14, %s1074_s13 }
  0x27   : > { %p1506_p5 = scmp.eq.s32.totalorder %s1090_s17, 0  ;;  %p856_p9 = scmp.lt.s32.totalorder %s1090_s17, 4 }
  0x28   : > { %s1518_s25 = smov (%p1504_p0, %s29_s25), 0  ;;  %s1211_s11 = sand.u32 1, %s1078_s14  }
  0x29   : > { %p48_p6 = por %p1506_p5, %p1505_p2  ;;  %s36_s10 = ssub.s32 %s1086_s16, %s1518_s25 }
  0x2a   : > { %p37_p10 = scmp.eq.s32.totalorder %s36_s10, 0  ;;  %s684_s12 = sshll.u32 %s1211_s11, 5 }
  0x2b   : > { %s700_s21 = sshll.u32 %s1086_s16, 9  ;;  %s174_s28 = scalar_lea.vmem [#allocation2], %s684_s12 }
  0x2c   : > { %s1218_s24 = scalar_select %p37_p10, %s1078_s14, %s39_s23  }
  0x2d   : > { %s1225_s27 = scalar_lea.hbm %s1493_s0, %s700_s21  ;;  %s182_s29 = sshll.u32 %s174_s28, 4  ;;  %s1231_s29 = int_to_ptr.vmem [resolvable:$true] %s182_s29 }
  0x2e   : > { %p1227_p8 = pnand %p856_p9, %p48_p6  ;;  %s687_s23 = sshll.u32 %s1211_s11, 10 }
  0x2f   : > { %s171_s4 = scalar_lea.sflag [#allocation3], %s1211_s11  ;;  %s942_s5 = scalar_lea.hbm %s1225_s27, 512 }
  0x30   : > { %p943_p11 = scmp.ne.s32.totalorder %s1225_s27, %s942_s5  ;;  %p944_p12 = pneg %p1227_p8 }
  0x31   : > { %s947_s8 = scalar_lea.hbm %s1493_s0, 2048  ;;  %p948_p3 = scmp.lt.u32.totalorder %s1225_s27, %s1493_s0 }
  0x32   : > { %p945_p13 = pnand %p944_p12, %p943_p11  ;;  %p949_p4 = scmp.lt.u32.totalorder %s947_s8, %s942_s5 }
  0x33   : > { %p951_p0 = scmp.lt.u32.totalorder %s942_s5, %s1225_s27 }
  0x34   : > { %p946_p1 = pneg %p945_p13  ;;  %p950_p7 = por %p949_p4, %p948_p3 }
  0x36   : > { %p952_p2 = por %p951_p0, %p950_p7 }
  0x38   : > { %p953_p5 = pnand %p952_p2, %p946_p1 }
  0x3a   : > { %956 = shalt.err (!%p953_p5)
}
  0x3b   : > { %s957_s12 = scalar_lea.vmem %s1231_s29, 512  ;;  %s1093_s22 = smov [#allocation2]  }
  0x3c   : > { %p958_p6 = scmp.ne.s32.totalorder %s1231_s29, %s957_s12  ;;  %s962_s26 = sshll.u32 %s1093_s22, 4  ;;  %s963_s26 = int_to_ptr.vmem [resolvable:$false] %s962_s26 }
  0x3d   : > { %s964_s28 = scalar_lea.vmem %s963_s26, 1024  ;;  %p965_p11 = scmp.lt.s32.totalorder %s1231_s29, %s963_s26 }
  0x3e   : > { %p960_p9 = pnand %p958_p6, %p944_p12  ;;  %p966_p13 = scmp.lt.s32.totalorder %s964_s28, %s957_s12 }
  0x40   : > { %p961_p10 = pneg %p960_p9  ;;  %p967_p3 = por %p966_p13, %p965_p11 }
  0x42   : > { %p968_p4 = pnand %p967_p3, %p961_p10 }
  0x44   : > { %971 = shalt.err (!%p968_p4)
}
  0x45   : > { %851 = dma.hbm_to_vmem [thread:$0]  (!%p1227_p8), %s1225_s27, 512, %s1231_s29, %s171_s4  }
  0x46   : > { %s1265_s7 = scalar_lea.hbm %s1494_s1, %s700_s21  ;;  %s193_s8 = scalar_lea.vmem [#allocation5], %s687_s23 }
  0x47   : > { %s203_s9 = sshll.u32 %s193_s8, 4  ;;  %s189_s10 = sand.u32 1, %s1090_s17   ;;  %s1269_s9 = int_to_ptr.vmem [resolvable:$true] %s203_s9 }
  0x48   : > { %s1272_s12 = scalar_lea.sflag [#allocation6], %s189_s10  ;;  %s972_s22 = scalar_lea.hbm %s1265_s7, 16384 }
  0x49   : > { %p973_p1 = scmp.ne.s32.totalorder %s1265_s7, %s972_s22  ;;  %s977_s11 = scalar_lea.hbm %s1494_s1, 65536 }
  0x4a   : > { %p978_p2 = scmp.lt.u32.totalorder %s1265_s7, %s1494_s1  ;;  %p979_p5 = scmp.lt.u32.totalorder %s977_s11, %s972_s22 }
  0x4b   : > { %p975_p7 = pnand %p973_p1, %p944_p12  ;;  %p981_p9 = scmp.lt.u32.totalorder %s972_s22, %s1265_s7 }
  0x4c   : > { %p980_p6 = por %p979_p5, %p978_p2 }
  0x4d   : > { %p976_p0 = pneg %p975_p7 }
  0x4e   : > { %p982_p10 = por %p981_p9, %p980_p6 }
  0x50   : > { %p983_p11 = pnand %p982_p10, %p976_p0 }
  0x52   : > { %986 = shalt.err (!%p983_p11)
}
  0x53   : > { %s987_s23 = scalar_lea.vmem %s1269_s9, 16384  ;;  %s1094_s26 = smov [#allocation5]  }
  0x54   : > { %p988_p13 = scmp.ne.s32.totalorder %s1269_s9, %s987_s23  ;;  %s992_s28 = sshll.u32 %s1094_s26, 4  ;;  %s993_s28 = int_to_ptr.vmem [resolvable:$false] %s992_s28 }
  0x55   : > { %s994_s5 = scalar_lea.vmem %s993_s28, 32768  ;;  %p995_p1 = scmp.lt.s32.totalorder %s1269_s9, %s993_s28 }
  0x56   : > { %p990_p3 = pnand %p988_p13, %p944_p12  ;;  %p996_p7 = scmp.lt.s32.totalorder %s994_s5, %s987_s23 }
  0x58   : > { %p991_p4 = pneg %p990_p3  ;;  %p997_p2 = por %p996_p7, %p995_p1 }
  0x5a   : > { %p998_p5 = pnand %p997_p2, %p991_p4 }
  0x5c   : > { %1001 = shalt.err (!%p998_p5)
}
  0x5d   : > { %s1095_s6 = smov 2048   ;;  %s1096_s8 = smov 512  }
  0x5e   : > { %s1097_s10 = smov 32   ;;  %p1508_p12 = scmp.ne.s32.totalorder %s1501_s20, 0 }
  0x5f   : > { %854 = dma.hbm_to_vmem [thread:$0]  (!%p1227_p8), %s1265_s7, 16384, %s1269_s9, %s1272_s12, %s1095_s6, %s1096_s8, %s1097_s10  }
  0x60   : > { %215 = sbr.rel (%p1508_p12) target bundleno = 507 (0x1fb), region = 32  ;;  %s217_s22 = sand.u32 (!%p1508_p12), 1, %s1074_s13  }
  0x61   : > { %s691_s21 = sshll.u32 (!%p1508_p12), %s217_s22, 5  ;;  %s218_s27 = scalar_lea.sflag (!%p1508_p12), [#allocation3], %s217_s22 }
  0x62   : > { %s1301_s11 = scalar_lea.vmem (!%p1508_p12), [#allocation2], %s691_s21  ;;  %p1509_p0 = scmp.ne.s32.totalorder (!%p1508_p12), %s1500_s19, 0 }
  0x67   : > { %1053 = dma.done.wait (%p1509_p0), %s218_s27, 512  }
  0x68   : > { %1055 = vsyncadd (%p1509_p0), %s218_s27, 4294966784  ;;  %s226_s29 = sand.u32 1, %s1149_s18   ;;  %s692_s30 = sshll.u32 %s217_s22, 10 }
  0x69   : > { %s227_s7 = scalar_lea.sflag [#allocation6], %s226_s29  ;;  %s1308_s9 = scalar_lea.vmem [#allocation5], %s692_s30 }
  0x6a   : > { %1057 = dma.done.wait (%p1509_p0), %s227_s7, 16384  }
  0x6b   : > { %1059 = vsyncadd (%p1509_p0), %s227_s7, 4294950912  ;;  %p1510_p8 = scmp.eq.s32.totalorder %s1149_s18, 0 }
  0x6d   : > { %1061 = dma.done.wait (%p1510_p8), [#allocation6], 32   ;;  %p1511_p6 = pmov %p1510_p8 }
  0x6e   : > { %p694_p9 = scmp.ne.s32.totalorder %s1082_s15, 0 }
  0x6f   : > { %1063 = vsyncadd (%p1511_p6), [#allocation6], 4294967264  ;;  %v1098_v0 = vmov (!%p694_p9), 0.0  }
  0x70   : > { %265 = sbr.rel (%p694_p9) target bundleno = 119 (0x77), region = 48  ;;  %266 = vst [vmem:[#allocation8] sm:$0xff] (!%p694_p9), %v1098_v0  ;;  %267 = vst [vmem:[#allocation8 + $0x8] sm:$0xff] (!%p694_p9), %v1098_v0 }
  0x77 PF: > { %v273_v1 = vld [vmem:[%s1308_s9 + $0x8] sm:$0xff]  ;;  %v275_v3 = vld [vmem:[%s1308_s9 + $0x18] sm:$0xff]  ;;  %v272_v6 = vld [vmem:[%s1308_s9] sm:$0xff]  ;;  %p695_p10 = scmp.ne.s32.totalorder %s1082_s15, 3 }
  0x78   : > { %v277_v2 = vld [vmem:[%s1308_s9 + $0x28] sm:$0xff]  ;;  %v279_v5 = vld [vmem:[%s1308_s9 + $0x38] sm:$0xff]  ;;  %v276_v7 = vld [vmem:[%s1308_s9 + $0x20] sm:$0xff] }
  0x79   : > { %v702_v4 = vpack.c.bf16 %v277_v2, %v273_v1  ;;  %v766_v8 = vpack.c.bf16 %v279_v5, %v275_v3  ;;  %v704_v9 = vpack.c.bf16 %v276_v7, %v272_v6  ;;  %v274_v10 = vld [vmem:[%s1308_s9 + $0x10] sm:$0xff]  ;;  %v281_v12 = vld [vmem:[%s1308_s9 + $0x48] sm:$0xff]  ;;  %v283_v15 = vld [vmem:[%s1308_s9 + $0x58] sm:$0xff] }
  0x7a   : > { %v278_v11 = vld [vmem:[%s1308_s9 + $0x30] sm:$0xff]  ;;  %v285_v14 = vld [vmem:[%s1308_s9 + $0x68] sm:$0xff]  ;;  %v287_v16 = vld [vmem:[%s1308_s9 + $0x78] sm:$0xff] }
  0x7b   : > { %703 = vmatprep.subr.bf16.mxu1 %v702_v4  ;;  %v768_v13 = vpack.c.bf16 %v278_v11, %v274_v10  ;;  %767 = vmatprep.subr.bf16.mxu0 %v766_v8  ;;  %v706_v17 = vpack.c.bf16 %v285_v14, %v281_v12  ;;  %v770_v18 = vpack.c.bf16 %v287_v16, %v283_v15  ;;  %v280_v19 = vld [vmem:[%s1308_s9 + $0x40] sm:$0xff]  ;;  %v282_v21 = vld [vmem:[%s1308_s9 + $0x50] sm:$0xff]  ;;  %v289_v23 = vld [vmem:[%s1308_s9 + $0x88] sm:$0xff] }
  0x7c   : > { %705 = vmatpush1.bf16.xpose.msra.mxu1 %v704_v9  ;;  %v284_v20 = vld [vmem:[%s1308_s9 + $0x60] sm:$0xff]  ;;  %v286_v22 = vld [vmem:[%s1308_s9 + $0x70] sm:$0xff]  ;;  %v293_v24 = vld [vmem:[%s1308_s9 + $0xa8] sm:$0xff] }
  0x7d   : > { %769 = vmatpush1.bf16.xpose.msra.mxu0 %v768_v13  ;;  %707 = vmatprep.subr.bf16.mxu1 %v706_v17  ;;  %v291_v25 = vld [vmem:[%s1308_s9 + $0x98] sm:$0xff]  ;;  %v708_v27 = vpack.c.bf16 %v284_v20, %v280_v19  ;;  %v772_v28 = vpack.c.bf16 %v286_v22, %v282_v21  ;;  %v710_v29 = vpack.c.bf16 %v293_v24, %v289_v23  ;;  %v288_v31 = vld [vmem:[%s1308_s9 + $0x80] sm:$0xff]  ;;  %v290_v33 = vld [vmem:[%s1308_s9 + $0x90] sm:$0xff] }
  0x7e   : > { %771 = vmatprep.subr.bf16.mxu0 %v770_v18  ;;  %v295_v26 = vld [vmem:[%s1308_s9 + $0xb8] sm:$0xff]  ;;  %v292_v32 = vld [vmem:[%s1308_s9 + $0xa0] sm:$0xff]  ;;  %v294_v34 = vld [vmem:[%s1308_s9 + $0xb0] sm:$0xff] }
  0x7f   : > { %v774_v30 = vpack.c.bf16 %v295_v26, %v291_v25  ;;  %v297_v35 = vld [vmem:[%s1308_s9 + $0xc8] sm:$0xff]  ;;  %v299_v37 = vld [vmem:[%s1308_s9 + $0xd8] sm:$0xff]  ;;  %v712_v39 = vpack.c.bf16 %v292_v32, %v288_v31  ;;  %v776_v40 = vpack.c.bf16 %v294_v34, %v290_v33  ;;  %v296_v43 = vld [vmem:[%s1308_s9 + $0xc0] sm:$0xff] }
  0x80   : > { %v301_v36 = vld [vmem:[%s1308_s9 + $0xe8] sm:$0xff]  ;;  %v303_v38 = vld [vmem:[%s1308_s9 + $0xf8] sm:$0xff]  ;;  %v300_v44 = vld [vmem:[%s1308_s9 + $0xe0] sm:$0xff] }
  0x81   : > { %v714_v41 = vpack.c.bf16 %v301_v36, %v297_v35  ;;  %v778_v42 = vpack.c.bf16 %v303_v38, %v299_v37  ;;  %v298_v45 = vld [vmem:[%s1308_s9 + $0xd0] sm:$0xff]  ;;  %v305_v47 = vld [vmem:[%s1308_s9 + $0x108] sm:$0xff]  ;;  %v307_v49 = vld [vmem:[%s1308_s9 + $0x118] sm:$0xff]  ;;  %v716_v51 = vpack.c.bf16 %v300_v44, %v296_v43 }
  0x82   : > { %v302_v46 = vld [vmem:[%s1308_s9 + $0xf0] sm:$0xff]  ;;  %v309_v48 = vld [vmem:[%s1308_s9 + $0x128] sm:$0xff]  ;;  %v311_v50 = vld [vmem:[%s1308_s9 + $0x138] sm:$0xff] }
  0x83   : > { %v780_v52 = vpack.c.bf16 %v302_v46, %v298_v45  ;;  %v718_v53 = vpack.c.bf16 %v309_v48, %v305_v47  ;;  %v782_v54 = vpack.c.bf16 %v311_v50, %v307_v49  ;;  %v304_v55 = vld [vmem:[%s1308_s9 + $0x100] sm:$0xff]  ;;  %v306_v57 = vld [vmem:[%s1308_s9 + $0x110] sm:$0xff]  ;;  %v313_v59 = vld [vmem:[%s1308_s9 + $0x148] sm:$0xff] }
  0x84   : > { %709 = vmatpush1.bf16.xpose.msra.mxu1 %v708_v27  ;;  %v308_v56 = vld [vmem:[%s1308_s9 + $0x120] sm:$0xff]  ;;  %v310_v58 = vld [vmem:[%s1308_s9 + $0x130] sm:$0xff]  ;;  %v317_v60 = vld [vmem:[%s1308_s9 + $0x168] sm:$0xff] }
  0x85   : > { %773 = vmatpush1.bf16.xpose.msra.mxu0 %v772_v28  ;;  %711 = vmatprep.subr.bf16.mxu1 %v710_v29  ;;  %v315_v61 = vld [vmem:[%s1308_s9 + $0x158] sm:$0xff]  ;;  %v720_v63 = vpack.c.bf16 %v308_v56, %v304_v55  ;;  %v784_v0 = vpack.c.bf16 %v310_v58, %v306_v57  ;;  %v722_v1 = vpack.c.bf16 %v317_v60, %v313_v59  ;;  %v312_v3 = vld [vmem:[%s1308_s9 + $0x140] sm:$0xff]  ;;  %v314_v5 = vld [vmem:[%s1308_s9 + $0x150] sm:$0xff] }
  0x86   : > { %775 = vmatprep.subr.bf16.mxu0 %v774_v30  ;;  %v319_v62 = vld [vmem:[%s1308_s9 + $0x178] sm:$0xff]  ;;  %v316_v4 = vld [vmem:[%s1308_s9 + $0x160] sm:$0xff]  ;;  %v318_v6 = vld [vmem:[%s1308_s9 + $0x170] sm:$0xff] }
  0x87   : > { %v786_v2 = vpack.c.bf16 %v319_v62, %v315_v61  ;;  %v321_v7 = vld [vmem:[%s1308_s9 + $0x188] sm:$0xff]  ;;  %v323_v9 = vld [vmem:[%s1308_s9 + $0x198] sm:$0xff]  ;;  %v724_v11 = vpack.c.bf16 %v316_v4, %v312_v3  ;;  %v788_v12 = vpack.c.bf16 %v318_v6, %v314_v5  ;;  %v320_v17 = vld [vmem:[%s1308_s9 + $0x180] sm:$0xff] }
  0x88   : > { %v325_v8 = vld [vmem:[%s1308_s9 + $0x1a8] sm:$0xff]  ;;  %v327_v10 = vld [vmem:[%s1308_s9 + $0x1b8] sm:$0xff]  ;;  %v324_v18 = vld [vmem:[%s1308_s9 + $0x1a0] sm:$0xff] }
  0x89   : > { %v726_v13 = vpack.c.bf16 %v325_v8, %v321_v7  ;;  %v790_v14 = vpack.c.bf16 %v327_v10, %v323_v9  ;;  %v269_v15 = vld [vmem:[%s1301_s11 + $0x8] sm:$0xff]  ;;  %v271_v16 = vld [vmem:[%s1301_s11 + $0x18] sm:$0xff]  ;;  %v322_v19 = vld [vmem:[%s1308_s9 + $0x190] sm:$0xff]  ;;  %v728_v25 = vpack.c.bf16 %v324_v18, %v320_v17 }
  0x8a   : > { %466 = vmatprep.mubr.f32.mxu1 %v269_v15  ;;  %537 = vmatprep.mubr.f32.mxu0 %v271_v16  ;;  %v326_v20 = vld [vmem:[%s1308_s9 + $0x1b0] sm:$0xff]  ;;  %v329_v21 = vld [vmem:[%s1308_s9 + $0x1c8] sm:$0xff]  ;;  %v331_v23 = vld [vmem:[%s1308_s9 + $0x1d8] sm:$0xff] }
  0x8b   : > { %v333_v22 = vld [vmem:[%s1308_s9 + $0x1e8] sm:$0xff]  ;;  %v335_v24 = vld [vmem:[%s1308_s9 + $0x1f8] sm:$0xff]  ;;  %v792_v26 = vpack.c.bf16 %v326_v20, %v322_v19  ;;  %v328_v29 = vld [vmem:[%s1308_s9 + $0x1c0] sm:$0xff] }
  0x8c   : > { %713 = vmatpush1.bf16.xpose.msra.mxu1 %v712_v39  ;;  %v730_v27 = vpack.c.bf16 %v333_v22, %v329_v21  ;;  %v794_v28 = vpack.c.bf16 %v335_v24, %v331_v23  ;;  %v332_v30 = vld [vmem:[%s1308_s9 + $0x1e0] sm:$0xff]  ;;  %v330_v31 = vld [vmem:[%s1308_s9 + $0x1d0] sm:$0xff]  ;;  %v337_v33 = vld [vmem:[%s1308_s9 + $0x208] sm:$0xff] }
  0x8d   : > { %777 = vmatpush1.bf16.xpose.msra.mxu0 %v776_v40  ;;  %715 = vmatprep.subr.bf16.mxu1 %v714_v41  ;;  %v334_v32 = vld [vmem:[%s1308_s9 + $0x1f0] sm:$0xff]  ;;  %v341_v34 = vld [vmem:[%s1308_s9 + $0x228] sm:$0xff]  ;;  %v339_v35 = vld [vmem:[%s1308_s9 + $0x218] sm:$0xff]  ;;  %v732_v37 = vpack.c.bf16 %v332_v30, %v328_v29 }
  0x8e   : > { %779 = vmatprep.subr.bf16.mxu0 %v778_v42  ;;  %v343_v36 = vld [vmem:[%s1308_s9 + $0x238] sm:$0xff]  ;;  %v796_v38 = vpack.c.bf16 %v334_v32, %v330_v31  ;;  %v734_v39 = vpack.c.bf16 %v341_v34, %v337_v33  ;;  %v336_v41 = vld [vmem:[%s1308_s9 + $0x200] sm:$0xff]  ;;  %v338_v43 = vld [vmem:[%s1308_s9 + $0x210] sm:$0xff] }
  0x8f   : > { %v798_v40 = vpack.c.bf16 %v343_v36, %v339_v35  ;;  %v340_v42 = vld [vmem:[%s1308_s9 + $0x220] sm:$0xff]  ;;  %v342_v44 = vld [vmem:[%s1308_s9 + $0x230] sm:$0xff]  ;;  %v345_v45 = vld [vmem:[%s1308_s9 + $0x248] sm:$0xff] }
  0x90   : > { %v349_v46 = vld [vmem:[%s1308_s9 + $0x268] sm:$0xff]  ;;  %v347_v47 = vld [vmem:[%s1308_s9 + $0x258] sm:$0xff]  ;;  %v736_v49 = vpack.c.bf16 %v340_v42, %v336_v41  ;;  %v800_v50 = vpack.c.bf16 %v342_v44, %v338_v43  ;;  %v346_v55 = vld [vmem:[%s1308_s9 + $0x250] sm:$0xff] }
  0x91   : > { %v351_v48 = vld [vmem:[%s1308_s9 + $0x278] sm:$0xff]  ;;  %v350_v56 = vld [vmem:[%s1308_s9 + $0x270] sm:$0xff]  ;;  %v353_v57 = vld [vmem:[%s1308_s9 + $0x288] sm:$0xff] }
  0x92   : > { %v357_v58 = vld [vmem:[%s1308_s9 + $0x2a8] sm:$0xff]  ;;  %v355_v59 = vld [vmem:[%s1308_s9 + $0x298] sm:$0xff]  ;;  %v804_v62 = vpack.c.bf16 %v350_v56, %v346_v55  ;;  %v354_v3 = vld [vmem:[%s1308_s9 + $0x290] sm:$0xff] }
  0x93   : > { %v359_v60 = vld [vmem:[%s1308_s9 + $0x2b8] sm:$0xff]  ;;  %v358_v4 = vld [vmem:[%s1308_s9 + $0x2b0] sm:$0xff]  ;;  %v361_v5 = vld [vmem:[%s1308_s9 + $0x2c8] sm:$0xff] }
  0x94   : > { %717 = vmatpush1.bf16.xpose.msra.mxu1 %v716_v51  ;;  %v738_v51 = vpack.c.bf16 %v349_v46, %v345_v45  ;;  %v365_v6 = vld [vmem:[%s1308_s9 + $0x2e8] sm:$0xff]  ;;  %v363_v7 = vld [vmem:[%s1308_s9 + $0x2d8] sm:$0xff]  ;;  %v808_v10 = vpack.c.bf16 %v358_v4, %v354_v3  ;;  %v362_v15 = vld [vmem:[%s1308_s9 + $0x2d0] sm:$0xff] }
  0x95   : > { %781 = vmatpush1.bf16.xpose.msra.mxu0 %v780_v52  ;;  %719 = vmatprep.subr.bf16.mxu1 %v718_v53  ;;  %v802_v52 = vpack.c.bf16 %v351_v48, %v347_v47  ;;  %v344_v53 = vld [vmem:[%s1308_s9 + $0x240] sm:$0xff]  ;;  %v367_v8 = vld [vmem:[%s1308_s9 + $0x2f8] sm:$0xff]  ;;  %v366_v16 = vld [vmem:[%s1308_s9 + $0x2f0] sm:$0xff] }
  0x96   : > { %783 = vmatprep.subr.bf16.mxu0 %v782_v54  ;;  %v348_v54 = vld [vmem:[%s1308_s9 + $0x260] sm:$0xff]  ;;  %v369_v17 = vld [vmem:[%s1308_s9 + $0x308] sm:$0xff]  ;;  %v371_v19 = vld [vmem:[%s1308_s9 + $0x318] sm:$0xff]  ;;  %v812_v22 = vpack.c.bf16 %v366_v16, %v362_v15  ;;  %v556_v15 = vlaneseq (!%p695_p10) }
  0x97   : > { %v740_v61 = vpack.c.bf16 %v348_v54, %v344_v53  ;;  %v373_v18 = vld [vmem:[%s1308_s9 + $0x328] sm:$0xff]  ;;  %v375_v20 = vld [vmem:[%s1308_s9 + $0x338] sm:$0xff]  ;;  %v268_v3 = vld [vmem:[%s1301_s11] sm:$0xff] }
  0x98   : > { %v750_v23 = vpack.c.bf16 %v373_v18, %v369_v17  ;;  %v814_v24 = vpack.c.bf16 %v375_v20, %v371_v19  ;;  %v377_v29 = vld [vmem:[%s1308_s9 + $0x348] sm:$0xff]  ;;  %v379_v31 = vld [vmem:[%s1308_s9 + $0x358] sm:$0xff]  ;;  %v270_v4 = vld [vmem:[%s1301_s11 + $0x10] sm:$0xff]  ;;  %v557_v16 = vshrl.u32 (!%p695_p10), %v556_v15, 7 }
  0x99   : > { %v381_v30 = vld [vmem:[%s1308_s9 + $0x368] sm:$0xff]  ;;  %v383_v32 = vld [vmem:[%s1308_s9 + $0x378] sm:$0xff]  ;;  %v554_v17 = vld [vmem:[#allocation7] sm:$0x3] (!%p695_p10) }
  0x9a   : > { %v754_v35 = vpack.c.bf16 %v381_v30, %v377_v29  ;;  %v818_v36 = vpack.c.bf16 %v383_v32, %v379_v31  ;;  %v385_v41 = vld [vmem:[%s1308_s9 + $0x388] sm:$0xff]  ;;  %v387_v43 = vld [vmem:[%s1308_s9 + $0x398] sm:$0xff]  ;;  %v558_v18 = vsub.s32 (!%p695_p10), 0, %v557_v16  ;;  %v562_v19 = vsub.s32 (!%p695_p10), 1, %v557_v16 }
  0x9b   : > { %v389_v42 = vld [vmem:[%s1308_s9 + $0x3a8] sm:$0xff]  ;;  %v391_v44 = vld [vmem:[%s1308_s9 + $0x3b8] sm:$0xff] }
  0x9c   : > { %721 = vmatpush1.bf16.xpose.msra.mxu1 %v720_v63  ;;  %v742_v63 = vpack.c.bf16 %v357_v58, %v353_v57  ;;  %v758_v47 = vpack.c.bf16 %v389_v42, %v385_v41  ;;  %v822_v48 = vpack.c.bf16 %v391_v44, %v387_v43  ;;  %v393_v53 = vld [vmem:[%s1308_s9 + $0x3c8] sm:$0xff]  ;;  %v395_v55 = vld [vmem:[%s1308_s9 + $0x3d8] sm:$0xff] }
  0x9d   : > { %785 = vmatpush1.bf16.xpose.msra.mxu0 %v784_v0  ;;  %723 = vmatprep.subr.bf16.mxu1 %v722_v1  ;;  %v806_v0 = vpack.c.bf16 %v359_v60, %v355_v59  ;;  %v352_v1 = vld [vmem:[%s1308_s9 + $0x280] sm:$0xff]  ;;  %v397_v54 = vld [vmem:[%s1308_s9 + $0x3e8] sm:$0xff]  ;;  %v399_v56 = vld [vmem:[%s1308_s9 + $0x3f8] sm:$0xff] }
  0x9e   : > { %787 = vmatprep.subr.bf16.mxu0 %v786_v2  ;;  %v356_v2 = vld [vmem:[%s1308_s9 + $0x2a0] sm:$0xff]  ;;  %v762_v59 = vpack.c.bf16 %v397_v54, %v393_v53  ;;  %v826_v60 = vpack.c.bf16 %v399_v56, %v395_v55 }
  0x9f   : > { %v744_v9 = vpack.c.bf16 %v356_v2, %v352_v1 }
  0xa4   : > { %725 = vmatpush1.bf16.xpose.msra.mxu1 %v724_v11  ;;  %v746_v11 = vpack.c.bf16 %v365_v6, %v361_v5  ;;  %v400_v6 = vld [vmem:[#allocation8] sm:$0xff] }
  0xa5   : > { %789 = vmatpush1.bf16.xpose.msra.mxu0 %v788_v12  ;;  %727 = vmatprep.subr.bf16.mxu1 %v726_v13  ;;  %v810_v12 = vpack.c.bf16 %v367_v8, %v363_v7  ;;  %v360_v13 = vld [vmem:[%s1308_s9 + $0x2c0] sm:$0xff] }
  0xa6   : > { %791 = vmatprep.subr.bf16.mxu0 %v790_v14  ;;  %v364_v14 = vld [vmem:[%s1308_s9 + $0x2e0] sm:$0xff] }
  0xa7   : > { %v748_v21 = vpack.c.bf16 %v364_v14, %v360_v13 }
  0xac   : > { %729 = vmatpush1.bf16.xpose.msra.mxu1 %v728_v25  ;;  %v368_v25 = vld [vmem:[%s1308_s9 + $0x300] sm:$0xff] }
  0xad   : > { %793 = vmatpush1.bf16.xpose.msra.mxu0 %v792_v26  ;;  %731 = vmatprep.subr.bf16.mxu1 %v730_v27  ;;  %v372_v26 = vld [vmem:[%s1308_s9 + $0x320] sm:$0xff]  ;;  %v370_v27 = vld [vmem:[%s1308_s9 + $0x310] sm:$0xff] }
  0xae   : > { %795 = vmatprep.subr.bf16.mxu0 %v794_v28  ;;  %v374_v28 = vld [vmem:[%s1308_s9 + $0x330] sm:$0xff]  ;;  %v752_v33 = vpack.c.bf16 %v372_v26, %v368_v25 }
  0xaf   : > { %v816_v34 = vpack.c.bf16 %v374_v28, %v370_v27 }
  0xb4   : > { %733 = vmatpush1.bf16.xpose.msra.mxu1 %v732_v37  ;;  %v376_v37 = vld [vmem:[%s1308_s9 + $0x340] sm:$0xff] }
  0xb5   : > { %797 = vmatpush1.bf16.xpose.msra.mxu0 %v796_v38  ;;  %735 = vmatprep.subr.bf16.mxu1 %v734_v39  ;;  %v380_v38 = vld [vmem:[%s1308_s9 + $0x360] sm:$0xff]  ;;  %v378_v39 = vld [vmem:[%s1308_s9 + $0x350] sm:$0xff] }
  0xb6   : > { %799 = vmatprep.subr.bf16.mxu0 %v798_v40  ;;  %v382_v40 = vld [vmem:[%s1308_s9 + $0x370] sm:$0xff]  ;;  %v756_v45 = vpack.c.bf16 %v380_v38, %v376_v37 }
  0xb7   : > { %v820_v46 = vpack.c.bf16 %v382_v40, %v378_v39 }
  0xbc   : > { %737 = vmatpush1.bf16.xpose.msra.mxu1 %v736_v49  ;;  %v384_v49 = vld [vmem:[%s1308_s9 + $0x380] sm:$0xff] }
  0xbd   : > { %801 = vmatpush1.bf16.xpose.msra.mxu0 %v800_v50  ;;  %739 = vmatprep.subr.bf16.mxu1 %v738_v51  ;;  %v388_v50 = vld [vmem:[%s1308_s9 + $0x3a0] sm:$0xff]  ;;  %v386_v51 = vld [vmem:[%s1308_s9 + $0x390] sm:$0xff] }
  0xbe   : > { %803 = vmatprep.subr.bf16.mxu0 %v802_v52  ;;  %v390_v52 = vld [vmem:[%s1308_s9 + $0x3b0] sm:$0xff]  ;;  %v760_v57 = vpack.c.bf16 %v388_v50, %v384_v49 }
  0xbf   : > { %v824_v58 = vpack.c.bf16 %v390_v52, %v386_v51 }
  0xc4   : > { %741 = vmatpush1.bf16.xpose.msra.mxu1 %v740_v61  ;;  %v392_v61 = vld [vmem:[%s1308_s9 + $0x3c0] sm:$0xff] }
  0xc5   : > { %805 = vmatpush1.bf16.xpose.msra.mxu0 %v804_v62  ;;  %743 = vmatprep.subr.bf16.mxu1 %v742_v63  ;;  %v396_v62 = vld [vmem:[%s1308_s9 + $0x3e0] sm:$0xff]  ;;  %v394_v63 = vld [vmem:[%s1308_s9 + $0x3d0] sm:$0xff] }
  0xc6   : > { %807 = vmatprep.subr.bf16.mxu0 %v806_v0  ;;  %v398_v0 = vld [vmem:[%s1308_s9 + $0x3f0] sm:$0xff]  ;;  %v764_v1 = vpack.c.bf16 %v396_v62, %v392_v61 }
  0xc7   : > { %v828_v2 = vpack.c.bf16 %v398_v0, %v394_v63 }
  0xcc   : > { %745 = vmatpush1.bf16.xpose.msra.mxu1 %v744_v9 }
  0xcd   : > { %809 = vmatpush1.bf16.xpose.msra.mxu0 %v808_v10  ;;  %747 = vmatprep.subr.bf16.mxu1 %v746_v11  ;;  %v401_v10 = vld [vmem:[#allocation8 + $0x8] sm:$0xff] }
  0xce   : > { %811 = vmatprep.subr.bf16.mxu0 %v810_v12 }
  0xd4   : > { %749 = vmatpush1.bf16.xpose.msra.mxu1 %v748_v21 }
  0xd5   : > { %813 = vmatpush1.bf16.xpose.msra.mxu0 %v812_v22  ;;  %751 = vmatprep.subr.bf16.mxu1 %v750_v23  ;;  %v559_v22 = vrot.slane (!%p695_p10), %v554_v17, %v558_v18  ;;  %v563_v23 = vrot.slane (!%p695_p10), %v554_v17, %v562_v19 }
  0xd6   : > { %815 = vmatprep.subr.bf16.mxu0 %v814_v24 }
  0xdc   : > { %753 = vmatpush1.bf16.xpose.msra.mxu1 %v752_v33 }
  0xdd   : > { %817 = vmatpush1.bf16.xpose.msra.mxu0 %v816_v34  ;;  %755 = vmatprep.subr.bf16.mxu1 %v754_v35 }
  0xde   : > { %819 = vmatprep.subr.bf16.mxu0 %v818_v36 }
  0xe4   : > { %757 = vmatpush1.bf16.xpose.msra.mxu1 %v756_v45 }
  0xe5   : > { %821 = vmatpush1.bf16.xpose.msra.mxu0 %v820_v46  ;;  %759 = vmatprep.subr.bf16.mxu1 %v758_v47 }
  0xe6   : > { %823 = vmatprep.subr.bf16.mxu0 %v822_v48 }
  0xec   : > { %761 = vmatpush1.bf16.xpose.msra.mxu1 %v760_v57 }
  0xed   : > { %825 = vmatpush1.bf16.xpose.msra.mxu0 %v824_v58  ;;  %763 = vmatprep.subr.bf16.mxu1 %v762_v59 }
  0xee   : > { %827 = vmatprep.subr.bf16.mxu0 %v826_v60 }
  0xf4   : > { %765 = vmatpush1.bf16.xpose.msra.mxu1 %v764_v1 }
  0xf5   : > { %829 = vmatpush1.bf16.xpose.msra.mxu0 %v828_v2 }
  0xfb   : > { %467 = vmatmul.mubr.f32.vlgmr.msra.gmra.mrb[0].mxu1 %v268_v3 }
  0xfc   : > { %538 = vmatmul.mubr.f32.vlgmr.msra.gmra.mrb[0].mxu0 %v270_v4 }
 0x1ce   : > { %v468_v5 = vpop.f32.mrb[0].mxu1 }
 0x1cf   : > { %v539_v7 = vpop.f32.mrb[0].mxu0  ;;  %v470_v8 = vpop.f32.mrb[1].mxu1  ;;  %551 = sbr.rel (%p695_p10) target bundleno = 482 (0x1e2), region = 52 }
 0x1d0   : > { %v540_v9 = vadd.f32 %v539_v7, %v468_v5  ;;  %v541_v11 = vpop.f32.mrb[1].mxu0 }
 0x1d1   : > { %v542_v12 = vadd.f32 %v541_v11, %v470_v8 }
 0x1d2   : > { %v544_v13 = vadd.f32 %v540_v9, %v400_v6 }
 0x1d3   : > { %v545_v14 = vadd.f32 %v542_v12, %v401_v10 }
 0x1d4   : > { %546 = vst [vmem:[#allocation8] sm:$0xff] %v544_v13 }
 0x1d5   : > { %547 = vst [vmem:[#allocation8 + $0x8] sm:$0xff] %v545_v14 }
 0x1db   : > { %v552_v20 = vld [vmem:[#allocation8] sm:$0xff] }
 0x1dc   : > { %v553_v21 = vld [vmem:[#allocation8 + $0x8] sm:$0xff]  ;;  %v566_v24 = vadd.f32 %v559_v22, %v552_v20 }
 0x1dd   : > { %v567_v25 = vadd.f32 %v563_v23, %v553_v21 }
 0x1de   : > { %v568_v26 = vmax.f32 %v566_v24, 0.0 }
 0x1df   : > { %v569_v27 = vmax.f32 %v567_v25, 0.0 }
 0x1e0   : > { %570 = vst [vmem:[#allocation8] sm:$0xff] %v568_v26 }
 0x1e1   : > { %571 = vst [vmem:[#allocation8 + $0x8] sm:$0xff] %v569_v27 }
 0x1e2 PF: > { %p858_p11 = scmp.eq.s32.totalorder %s1149_s18, 3  ;;  %s1099_s15 = smov [#allocation8]  }
 0x1e3   : > { %s582_s19 = sshll.u32 %s1099_s15, 4  ;;  %s583_s19 = int_to_ptr.vmem [resolvable:$true] %s582_s19 }
 0x1e4   : > { %s1002_s20 = scalar_lea.vmem %s583_s19, 256  ;;  %p1009_p1 = scmp.lt.s32.totalorder %s583_s19, %s583_s19 }
 0x1e5   : > { %p1003_p13 = scmp.ne.s32.totalorder %s583_s19, %s1002_s20  ;;  %p1010_p7 = scmp.lt.s32.totalorder %s1002_s20, %s1002_s20 }
 0x1e7   : > { %p1004_p3 = pnand %p1003_p13, %p858_p11  ;;  %p1011_p2 = por %p1010_p7, %p1009_p1 }
 0x1e9   : > { %p1005_p4 = pneg %p1004_p3 }
 0x1eb   : > { %p1012_p5 = pnand %p1011_p2, %p1005_p4 }
 0x1ed   : > { %1015 = shalt.err (!%p1012_p5)
}
 0x1ee   : > { %s1016_s23 = scalar_lea.hbm %s1496_s3, 256 }
 0x1ef   : > { %p1017_p12 = scmp.ne.s32.totalorder %s1496_s3, %s1016_s23  ;;  %p1022_p6 = scmp.lt.u32.totalorder %s1016_s23, %s1496_s3 }
 0x1f1   : > { %p1018_p0 = pnand %p1017_p12, %p858_p11 }
 0x1f3   : > { %p1019_p8 = pneg %p1018_p0 }
 0x1f5   : > { %p1024_p9 = pnand %p1022_p6, %p1019_p8 }
 0x1f7   : > { %1027 = shalt.err (!%p1024_p9)
}
 0x1f8   : > { %841 = dma.vmem_to_hbm [thread:$0]  (%p858_p11), %s583_s19, 256, %s1496_s3, [#allocation4]  }
 0x1f9   : > { %1065 = dma.done.wait (%p858_p11), [#allocation4], 256  }
 0x1fa   : > { %1067 = vsyncadd (%p858_p11), [#allocation4], 4294967040 }
 0x1fb PF: > { %s20_s17 = sadd.s32 1, %s1090_s17   ;;  %s1512_s12 = smov %s1074_s13 }
 0x1fc   : > { %p17_p10 = scmp.ge.s32.totalorder %s20_s17, 6   ;;  %s1513_s13 = smov %s1078_s14 }
 0x1fd   : > { %s1514_s14 = smov %s1218_s24  ;;  %s1515_s15 = smov %s1086_s16 }
 0x1fe   : > { %s1516_s16 = smov %s1518_s25  ;;  %19 = sbr.rel (!%p17_p10) target bundleno = 7 (0x7), region = 96 }
 0x205   :  { %595 = vsyncpa [#allocation3], 1 }
 0x206   :  { %597 = vsyncpa [#allocation3 + $0x1], 1 }
 0x207   :  { %598 = vsyncpa [#allocation6], 1 }
 0x208   :  { %600 = vsyncpa [#allocation6 + $0x1], 1 }
 0x209   :  { %601 = vsyncpa [#allocation4], 1 }
 0x20a   :  { %603 = vsyncpa [#allocation4 + $0x1], 1 }

</bundles_post_ra>
